<compile_context>
chip_gen: v7x
topology: tpu7x:2x2x1
jax: 0.10.0
libtpu: 0.0.40
codegen_flags: <defaults>
</compile_context>

<pallas_src>
import math

import jax
import jax.numpy as jnp
from jax.experimental import pallas as pl
from jax.experimental.pallas import tpu as pltpu

_LANES = 128
_ROW_CAP = 2048  # 2048 rows * 128 lanes * 4 B = 1 MiB input block (output block 2x)


def _round_up(a: int, b: int) -> int:
    return ((a + b - 1) // b) * b


def _is_power_of_two(s: float) -> bool:
    if s <= 0.0:
        return False
    m, _ = math.frexp(s)
    return m == 0.5


def _choose_row_tile(rows: int, n_batch: int) -> int:
    """Row tile: multiple of 8, capped at _ROW_CAP, shrunk so the grid has >=4 steps
    when the problem is big enough (keeps both v7x TensorCores busy)."""
    tr = min(_ROW_CAP, max(rows, 8))
    tr = _round_up(tr, 8)
    while n_batch * (-(-rows // tr)) < 4 and tr > 8:
        tr = max(8, _round_up(tr // 2, 8))
    return tr


def _make_qcat_kernel(scale: float, zero_point: int, qmin: float, qmax: float,
                      use_recip: bool):
    scale_f = float(scale)
    zp = float(zero_point)
    lo = qmin - zp            # folded +zp / -zp cancellation
    hi = qmax - zp
    inv_scale = 1.0 / scale_f

    def kernel(x_ref, o_ref):
        # x_ref block: (1, tr, 128); o_ref block: (1, 2, tr, 128)
        x = x_ref[0]                                        # (tr, 128) float32
        # quantize_per_tensor(x, 1.0, 0): integer repr (dequant of this step is identity)
        q1 = jnp.clip(jnp.round(x), qmin, qmax)
        # requantize to the cat output's (scale, zero_point)
        if use_recip:
            t = q1 * inv_scale                              # exact for power-of-two scale
        else:
            t = q1 / scale_f                                # parity path for arbitrary scale
        y = (jnp.clip(jnp.round(t), lo, hi) * scale_f).astype(o_ref.dtype)
        # compute once, store into both halves of the channel concat
        o_ref[0, 0, :, :] = y
        o_ref[0, 1, :, :] = y

    return kernel


def quantized_cat_append(x, scale=0.5, zero_point=1, dtype="quint8"):
    """x: (N, C, H, W) float32 -> (N, 2*C, H, W) float32."""
    if dtype == "quint8":
        qmin, qmax = 0.0, 255.0
    elif dtype == "qint8":
        qmin, qmax = -128.0, 127.0
    else:
        raise ValueError(f"unsupported quantized dtype: {dtype}")

    N, C, H, W = x.shape
    CHW = C * H * W

    # --- lane-dense, sublane-full view: (N, R, 128), R a multiple of the row tile ---
    rows0 = -(-CHW // _LANES)
    tr = _choose_row_tile(rows0, N)
    R = _round_up(rows0, tr)
    padded_len = R * _LANES

    x_flat = x.reshape(N, CHW)
    if padded_len > CHW:
        x_flat = jnp.pad(x_flat, ((0, 0), (0, padded_len - CHW)))
    x3 = x_flat.reshape(N, R, _LANES)

    grid = (N, R // tr)

    # VMEM budget from the real double-buffered working set (+ headroom), not 64 MiB.
    in_block = tr * _LANES * 4
    out_block = 2 * in_block
    vmem_limit = min(40 * 1024 * 1024,
                     max(16 * 1024 * 1024, 2 * (in_block + out_block) + 8 * 1024 * 1024))

    kernel = _make_qcat_kernel(float(scale), int(zero_point), qmin, qmax,
                               use_recip=_is_power_of_two(float(scale)))

    out4 = pl.pallas_call(
        kernel,
        out_shape=jax.ShapeDtypeStruct((N, 2, R, _LANES), jnp.float32),
        grid_spec=pl.GridSpec(
            grid=grid,
            in_specs=[
                pl.BlockSpec((1, tr, _LANES), lambda n, j: (n, j, 0)),
            ],
            out_specs=pl.BlockSpec((1, 2, tr, _LANES), lambda n, j: (n, 0, j, 0)),
        ),
        compiler_params=pltpu.CompilerParams(
            dimension_semantics=("parallel", "parallel"),
            vmem_limit_bytes=vmem_limit,
        ),
    )(x3)

    # (N, 2, R, 128) -> (N, 2, padded_len) -> strip pad -> (N, 2*C, H, W)
    out2 = out4.reshape(N, 2, padded_len)[:, :, :CHW]
    return out2.reshape(N, 2 * C, H, W)


def _reference(x, scale, zero_point, qmin, qmax):
    q1 = jnp.clip(jnp.round(x), qmin, qmax)
    q2 = jnp.clip(jnp.round(q1 / scale) + zero_point, qmin, qmax)
    y = (q2 - zero_point) * scale
    return jnp.concatenate([y, y], axis=1)


if __name__ == "__main__":
    key = jax.random.PRNGKey(0)
    # small NCHW input consistent with the test module
    x = jax.random.uniform(key, (2, 4, 16, 16), dtype=jnp.float32) * 10.0

    scale, zero_point, dtype = 0.5, 1, "quint8"

    out = quantized_cat_append(x, scale=scale, zero_point=zero_point, dtype=dtype)
    out = jax.block_until_ready(out)

    ref = _reference(x, scale, zero_point, 0.0, 255.0)
    assert out.shape == (2, 8, 16, 16), out.shape
    assert jnp.allclose(out, ref, atol=1e-6), "mismatch vs reference"

    print("KERNEL_OK")
</pallas_src>

<mosaic_0001>
module attributes {stable_mosaic.version = 11 : i64} {
  func.func @kernel(%arg0: i32, %arg1: i32, %arg2: memref<1x8x128xf32, #tpu.memory_space<vmem>>, %arg3: memref<1x2x8x128xf32, #tpu.memory_space<vmem>>) attributes {dimension_semantics = [#tpu.dimension_semantics<parallel>, #tpu.dimension_semantics<parallel>], iteration_bounds = array<i64: 2, 1>, scalar_prefetch = 0 : i64, scratch_operands = 0 : i64, tpu.core_type = #tpu.core_type<tc>, window_params = [{transform_indices = @transform_0, window_bounds = array<i64: 1, 8, 128>}, {transform_indices = @transform_1, window_bounds = array<i64: 1, 2, 8, 128>}]} {
    %c0 = arith.constant 0 : index
    %c0_0 = arith.constant 0 : index
    %c0_1 = arith.constant 0 : index
    %0 = vector.load %arg2[%c0, %c0_0, %c0_1] : memref<1x8x128xf32, #tpu.memory_space<vmem>>, vector<1x8x128xf32>
    %1 = vector.shape_cast %0 : vector<1x8x128xf32> to vector<8x128xf32>
    %2 = math.roundeven %1 : vector<8x128xf32>
    %cst = arith.constant 0.000000e+00 : f32
    %cst_2 = arith.constant 2.550000e+02 : f32
    %3 = vector.broadcast %cst : f32 to vector<8x128xf32>
    %4 = arith.maximumf %3, %2 : vector<8x128xf32>
    %5 = vector.broadcast %cst_2 : f32 to vector<8x128xf32>
    %6 = arith.minimumf %5, %4 : vector<8x128xf32>
    %cst_3 = arith.constant 2.000000e+00 : f32
    %7 = vector.broadcast %cst_3 : f32 to vector<8x128xf32>
    %8 = arith.mulf %6, %7 : vector<8x128xf32>
    %9 = math.roundeven %8 : vector<8x128xf32>
    %cst_4 = arith.constant -1.000000e+00 : f32
    %cst_5 = arith.constant 2.540000e+02 : f32
    %10 = vector.broadcast %cst_4 : f32 to vector<8x128xf32>
    %11 = arith.maximumf %10, %9 : vector<8x128xf32>
    %12 = vector.broadcast %cst_5 : f32 to vector<8x128xf32>
    %13 = arith.minimumf %12, %11 : vector<8x128xf32>
    %cst_6 = arith.constant 5.000000e-01 : f32
    %14 = vector.broadcast %cst_6 : f32 to vector<8x128xf32>
    %15 = arith.mulf %13, %14 : vector<8x128xf32>
    %c0_7 = arith.constant 0 : index
    %c0_8 = arith.constant 0 : index
    %c0_9 = arith.constant 0 : index
    %c0_10 = arith.constant 0 : index
    %16 = vector.load %arg3[%c0_7, %c0_8, %c0_9, %c0_10] : memref<1x2x8x128xf32, #tpu.memory_space<vmem>>, vector<1x1x8x128xf32>
    %17 = vector.shape_cast %16 : vector<1x1x8x128xf32> to vector<8x128xf32>
    %18 = vector.shape_cast %15 : vector<8x128xf32> to vector<1x1x8x128xf32>
    tpu.vector_store %arg3[%c0_7, %c0_8, %c0_9, %c0_10], %18 {strides = array<i32>} : memref<1x2x8x128xf32, #tpu.memory_space<vmem>>, vector<1x1x8x128xf32>,
    %c0_11 = arith.constant 0 : index
    %c1 = arith.constant 1 : index
    %c0_12 = arith.constant 0 : index
    %c0_13 = arith.constant 0 : index
    %19 = vector.load %arg3[%c0_11, %c1, %c0_12, %c0_13] : memref<1x2x8x128xf32, #tpu.memory_space<vmem>>, vector<1x1x8x128xf32>
    %20 = vector.shape_cast %19 : vector<1x1x8x128xf32> to vector<8x128xf32>
    %21 = vector.shape_cast %15 : vector<8x128xf32> to vector<1x1x8x128xf32>
    tpu.vector_store %arg3[%c0_11, %c1, %c0_12, %c0_13], %21 {strides = array<i32>} : memref<1x2x8x128xf32, #tpu.memory_space<vmem>>, vector<1x1x8x128xf32>,
    return
  }
  func.func @transform_0(%arg0: i32, %arg1: i32) -> (i32, i32, i32) {
    %c0_i32 = arith.constant 0 : i32
    %c0_i32_0 = arith.constant 0 : i32
    return %arg0, %arg1, %c0_i32 : i32, i32, i32
  }
  func.func @transform_1(%arg0: i32, %arg1: i32) -> (i32, i32, i32, i32) {
    %c0_i32 = arith.constant 0 : i32
    %c0_i32_0 = arith.constant 0 : i32
    %c0_i32_1 = arith.constant 0 : i32
    return %arg0, %c0_i32, %arg1, %c0_i32_0 : i32, i32, i32, i32
  }
}

</mosaic_0001>

<bundles_post_ra>
// kernel: tpu_custom_call.1
= control target key start
LH: loop header
LB: loop body
LE: loop exit
PB: predicated region body
PF: predicated region fallthrough
CT: control target
= control target key end

     0   :  { %6 = vsyncpa [#allocation3], 0  ;;  %s645_s0 = inlined_call_operand.hbm [shape: f32[2,8,128], index: 0, kind: input, shape index: {}]   ;;  %s646_s1 = inlined_call_operand.hbm [shape: f32[2,2,8,128], index: 1, kind: output, shape index: {}]  }
   0x1   :  { %8 = vsyncpa [#allocation3 + $0x1], 0 }
   0x2   :  { %9 = vsyncpa [#allocation4], 0 }
   0x3   :  { %11 = vsyncpa [#allocation4 + $0x1], 0  ;;  %s470_s6 = smov 0   ;;  %s472_s7 = smov 0  }
   0x4   :  { %s474_s8 = smov 0   ;;  %s476_s9 = smov 0  }
   0x5   :  { %s478_s10 = smov 0   ;;  %s480_s11 = smov 0  }
   0x6 LB: > { %s260_s12 = sadd.s32 4294967295, %s454_s11   ;;  %s261_s13 = sadd.s32 4294967294, %s454_s11   ;;  %s454_s11 = sphi %s480_s11, %s17_s11   ;;  %s450_s10 = sphi %s478_s10, %s662_s10   ;;  %s446_s9 = sphi %s476_s9, %s661_s9   ;;  %s442_s8 = sphi %s474_s8, %s660_s8   ;;  %s438_s7 = sphi %s472_s7, %s659_s7   ;;  %s434_s6 = sphi %s470_s6, %s658_s6  }
   0x7   : > { %s29_s14 = sadd.s32 1, %s450_s10  ;;  %s38_s15 = sadd.s32 1, %s442_s8 }
   0x8   : > { %p31_p0 = scmp.ge.s32.totalorder %s29_s14, 2  ;;  %p45_p1 = scmp.ne.s32.totalorder %s442_s8, %s438_s7 }
   0x9   : > { %p46_p2 = scmp.eq.s32.totalorder %s454_s11, 0  ;;  %p51_p3 = scmp.ne.s32.totalorder %s438_s7, %s434_s6 }
   0xa   : > { %s664_s14 = smov (%p31_p0, %s29_s14), 0  ;;  %p52_p5 = scmp.eq.s32.totalorder %s260_s12, 0 }
   0xb   : > { %p511_p4 = por %p46_p2, %p45_p1  ;;  %s33_s17 = ssub.s32 %s450_s10, %s664_s14 }
   0xc   : > { %p77_p6 = scmp.eq.s32.totalorder %s260_s12, 1  ;;  %p36_p7 = scmp.eq.s32.totalorder %s33_s17, 0 }
   0xd   : > { %p517_p8 = por %p52_p5, %p51_p3  ;;  %p83_p10 = scmp.eq.s32.totalorder %s261_s13, 1 }
   0xe   : > { %p521_p9 = por %p77_p6, %p45_p1  ;;  %p290_p13 = scmp.lt.s32.totalorder %s454_s11, 2 }
   0xf   : > { %s526_s20 = scalar_select %p36_p7, %s442_s8, %s38_s15  }
  0x10   : > { %s650_s19 = scalar_select %p521_p9, 1, 0 }
  0x11   : > { %p528_p11 = por %p83_p10, %p51_p3  ;;  %s103_s22 = sand.u32 1, %s442_s8  }
  0x12   : > { %s264_s23 = sshll.u32 %s103_s22, 3  ;;  %s265_s24 = sshll.u32 %s450_s10, 7 }
  0x13   : > { %s651_s21 = scalar_select %p528_p11, 1, 0 }
  0x14   : > { %s539_s27 = scalar_lea.hbm %s645_s0, %s265_s24  ;;  %s107_s28 = scalar_lea.vmem [#allocation2], %s264_s23 }
  0x15   : > { %s115_s29 = sshll.u32 %s107_s28, 4  ;;  %p545_p0 = pnand %p290_p13, %p511_p4  ;;  %s541_s29 = int_to_ptr.vmem [resolvable:$true] %s115_s29 }
  0x16   : > { %s104_s2 = scalar_lea.sflag [#allocation3], %s103_s22  ;;  %s342_s3 = scalar_lea.hbm %s539_s27, 128 }
  0x17   : > { %p343_p3 = scmp.ne.s32.totalorder %s539_s27, %s342_s3  ;;  %p344_p5 = pneg %p545_p0 }
  0x18   : > { %s347_s12 = scalar_lea.hbm %s645_s0, 256  ;;  %p348_p4 = scmp.lt.u32.totalorder %s539_s27, %s645_s0 }
  0x19   : > { %p345_p6 = pnand %p344_p5, %p343_p3  ;;  %p349_p10 = scmp.lt.u32.totalorder %s347_s12, %s342_s3 }
  0x1a   : > { %p351_p12 = scmp.lt.u32.totalorder %s342_s3, %s539_s27 }
  0x1b   : > { %p346_p7 = pneg %p345_p6  ;;  %p350_p13 = por %p349_p10, %p348_p4 }
  0x1d   : > { %p352_p1 = por %p351_p12, %p350_p13 }
  0x1f   : > { %p353_p2 = pnand %p352_p1, %p346_p7 }
  0x21   : > { %356 = shalt.err (!%p353_p2)
}
  0x22   : > { %s357_s16 = scalar_lea.vmem %s541_s29, 128  ;;  %s456_s17 = smov [#allocation2]  }
  0x23   : > { %p358_p3 = scmp.ne.s32.totalorder %s541_s29, %s357_s16  ;;  %s362_s22 = sshll.u32 %s456_s17, 4  ;;  %s363_s22 = int_to_ptr.vmem [resolvable:$false] %s362_s22 }
  0x24   : > { %s364_s23 = scalar_lea.vmem %s363_s22, 256  ;;  %p365_p9 = scmp.lt.s32.totalorder %s541_s29, %s363_s22 }
  0x25   : > { %p360_p6 = pnand %p358_p3, %p344_p5  ;;  %p366_p4 = scmp.lt.s32.totalorder %s364_s23, %s357_s16 }
  0x27   : > { %p361_p11 = pneg %p360_p6  ;;  %p367_p10 = por %p366_p4, %p365_p9 }
  0x29   : > { %p368_p12 = pnand %p367_p10, %p361_p11 }
  0x2b   : > { %371 = shalt.err (!%p368_p12)
}
  0x2c   : > { %285 = dma.hbm_to_vmem [thread:$0]  (!%p545_p0), %s539_s27, 128, %s541_s29, %s104_s2  }
  0x2d   : > { %p653_p1 = scmp.lt.s32.totalorder %s454_s11, 3  ;;  %p654_p2 = scmp.ge.s32.totalorder %s454_s11, 1 }
  0x2f   : > { %p121_p5 = pnand %p654_p2, %p653_p1 }
  0x30   : > { %s581_s24 = sand.u32 (!%p121_p5), 1, %s438_s7  }
  0x31   : > { %124 = sbr.rel (%p121_p5) target bundleno = 89 (0x59), region = 24  ;;  %s267_s25 = sshll.u32 (!%p121_p5), %s581_s24, 3 }
  0x32   : > { %s127_s26 = scalar_lea.sflag (!%p121_p5), [#allocation3], %s581_s24  ;;  %s130_s28 = scalar_lea.vmem (!%p121_p5), [#allocation2], %s267_s25 }
  0x38   : > { %425 = dma.done.wait (%p517_p8), %s127_s26, 128  }
  0x39   : > { %427 = vsyncadd (%p517_p8), %s127_s26, 4294967168  ;;  %v149_v0 = vld [vmem:[%s130_s28] sm:$0xff]  ;;  %s268_s27 = sshll.u32 %s581_s24, 4  ;;  %s275_s2 = sshll.u32 %s446_s9, 8 }
  0x3a   : > { %v276_v1 = vround.rtne.f32 %v149_v0  ;;  %s148_s29 = scalar_lea.vmem [#allocation5], %s268_s27  ;;  %s596_s4 = scalar_lea.hbm %s646_s1, %s275_s2 }
  0x3b   : > { %s176_s30 = sshll.u32 %s148_s29, 4  ;;  %s162_s5 = scalar_lea.sflag [#allocation4], %s581_s24  ;;  %s591_s30 = int_to_ptr.vmem [resolvable:$true] %s176_s30 }
  0x3c   : > { %v151_v2 = vmax.f32 %v276_v1, 0.0  ;;  %s372_s12 = scalar_lea.vmem %s591_s30, 256  ;;  %p655_p9 = scmp.ne.s32.totalorder %s650_s19, 0 }
  0x3d   : > { %p373_p8 = scmp.ne.s32.totalorder %s591_s30, %s372_s12  ;;  %s457_s9 = smov [#allocation5]  }
  0x3e   : > { %v152_v3 = vmin.f32 %v151_v2, 255.0  ;;  %s376_s13 = sshll.u32 %s457_s9, 4  ;;  %s377_s13 = int_to_ptr.vmem [resolvable:$false] %s376_s13 }
  0x3f   : > { %p374_p11 = pnand %p373_p8, %p655_p9  ;;  %s378_s15 = scalar_lea.vmem %s377_s13, 512 }
  0x40   : > { %v153_v4 = vmul.f32 2.0, %v152_v3  ;;  %p379_p7 = scmp.lt.s32.totalorder %s591_s30, %s377_s13  ;;  %p380_p13 = scmp.lt.s32.totalorder %s378_s15, %s372_s12 }
  0x41   : > { %p375_p0 = pneg %p374_p11 }
  0x42   : > { %v277_v5 = vround.rtne.f32 %v153_v4  ;;  %p381_p3 = por %p380_p13, %p379_p7 }
  0x44   : > { %v155_v6 = vmax.f32 %v277_v5, -1.0  ;;  %p382_p6 = pnand %p381_p3, %p375_p0 }
  0x46   : > { %v156_v7 = vmin.f32 %v155_v6, 254.0 }
  0x48   : > { %v157_v8 = vmul.f32 0.5, %v156_v7 }
  0x4a   : > { %158 = vst [vmem:[%s148_s29] sm:$0xff] %v157_v8  ;;  %269 = vst [vmem:[%s148_s29 + $0x8] sm:$0xff] %v157_v8 }
  0x4b   : > { %385 = shalt.err (!%p382_p6)
}
  0x4c   : > { %s386_s16 = scalar_lea.hbm %s596_s4, 256  ;;  %s390_s23 = scalar_lea.hbm %s646_s1, 512 }
  0x4d   : > { %p387_p4 = scmp.ne.s32.totalorder %s596_s4, %s386_s16  ;;  %p391_p1 = scmp.lt.u32.totalorder %s596_s4, %s646_s1 }
  0x4e   : > { %p392_p2 = scmp.lt.u32.totalorder %s390_s23, %s386_s16  ;;  %p394_p8 = scmp.lt.u32.totalorder %s386_s16, %s596_s4 }
  0x4f   : > { %p388_p10 = pnand %p387_p4, %p655_p9 }
  0x50   : > { %p393_p5 = por %p392_p2, %p391_p1 }
  0x51   : > { %p389_p12 = pneg %p388_p10 }
  0x52   : > { %p395_p11 = por %p394_p8, %p393_p5 }
  0x54   : > { %p396_p0 = pnand %p395_p11, %p389_p12 }
  0x56   : > { %399 = shalt.err (!%p396_p0)
}
  0x57   : > { %s458_s28 = smov 128   ;;  %s459_s27 = smov 8  }
  0x58   : > { %280 = dma.vmem_to_hbm [thread:$0]  (%p655_p9), %s591_s30, 256, %s596_s4, %s162_s5, %s458_s28, %s458_s28, %s459_s27  }
  0x59 PF: > { %s191_s29 = sand.u32 1, %s434_s6   ;;  %p656_p7 = scmp.ne.s32.totalorder %s651_s21, 0 }
  0x5a   : > { %p657_p13 = scmp.ge.s32.totalorder %s454_s11, 2  ;;  %s192_s2 = scalar_lea.sflag [#allocation4], %s191_s29 }
  0x5c   : > { %p287_p3 = pnand %p657_p13, %p656_p7 }
  0x5e   : > { %429 = dma.done.wait (!%p287_p3), %s192_s2, 256  }
  0x5f   : > { %431 = vsyncadd (!%p287_p3), %s192_s2, 4294967040  ;;  %s17_s11 = sadd.s32 1, %s454_s11   ;;  %s658_s6 = smov %s438_s7 }
  0x60   : > { %p14_p6 = scmp.ge.s32.totalorder %s17_s11, 4   ;;  %s659_s7 = smov %s442_s8 }
  0x61   : > { %s660_s8 = smov %s526_s20  ;;  %s661_s9 = smov %s450_s10 }
  0x62   : > { %s662_s10 = smov %s664_s14  ;;  %16 = sbr.rel (!%p14_p6) target bundleno = 6 (0x6), region = 70 }
  0x69   :  { %197 = vsyncpa [#allocation3], 1 }
  0x6a   :  { %199 = vsyncpa [#allocation3 + $0x1], 1 }
  0x6b   :  { %200 = vsyncpa [#allocation4], 1 }
  0x6c   :  { %202 = vsyncpa [#allocation4 + $0x1], 1 }

</bundles_post_ra>
